<compile_context>
chip_gen: v7x
topology: tpu7x:2x2x1
jax: 0.10.0
libtpu: 0.0.40
codegen_flags: <defaults>
</compile_context>

<pallas_src>
import math

import jax
import jax.numpy as jnp
import numpy as np
from jax import lax
from jax.experimental import pallas as pl
from jax.experimental.pallas import tpu as pltpu


def _round_up(x: int, m: int) -> int:
    return ((x + m - 1) // m) * m


def _build_pe_table(d_model: int, max_len: int) -> jnp.ndarray:
    """Deterministic sin/cos positional-encoding table (matches torch init)."""
    position = jnp.arange(max_len, dtype=jnp.float32)[:, None]            # (L, 1)
    div_term = jnp.exp(
        jnp.arange(0, d_model, 2, dtype=jnp.float32)
        * (-math.log(10000.0) / d_model)
    )                                                                     # (D/2,)
    pe = jnp.zeros((max_len, d_model), dtype=jnp.float32)
    pe = pe.at[:, 0::2].set(jnp.sin(position * div_term))
    pe = pe.at[:, 1::2].set(jnp.cos(position * div_term))
    return pe


def _pe_compute_kernel(idx_ref, div_ref, out_ref):
    """out[t, c] = sin(idx[t] * div_full[c]) if c is even else cos(...).

    idx_ref : VMEM (tn, 1)     float32 rounded+clamped indices
    div_ref : VMEM (1, d_pad)  float32 per-column div_term (div_term[c // 2])
    out_ref : VMEM (tn, d_pad) float32 output tile (dense store)
    """
    angle = idx_ref[...] * div_ref[...]                       # (tn, d_pad) broadcast
    col = lax.broadcasted_iota(jnp.int32, angle.shape, 1)     # column index
    out_ref[...] = jnp.where((col & 1) == 0,
                             jnp.sin(angle),
                             jnp.cos(angle)).astype(out_ref.dtype)


def positional_encoding_trans(pos: jnp.ndarray, d_model: int, max_len: int,
                              *, tn: int = 1024) -> jnp.ndarray:
    """pos: float32, any shape; returns pos.shape + (d_model,) (float32)."""
    orig_shape = pos.shape
    N = int(np.prod(orig_shape)) if orig_shape else 1
    pos_flat = pos.reshape(N)

    # torch.round == jnp.round (half-to-even).  Clamp keeps an OOB index from
    # producing garbage (PyTorch would raise); indices < 2^24 are exact in f32.
    idx_f = jnp.clip(jnp.round(pos_flat * jnp.float32(max_len)),
                     0.0, float(max_len - 1)).astype(jnp.float32)

    # Lane-dense output: pad d_model up to a multiple of 128.
    d_pad = _round_up(d_model, 128)

    # div_full[c] = exp(2*(c//2) * (-ln(10000)/d_model)) for c < d_model,
    # zero in pad columns (their outputs are sliced off).  Computed in f32 to
    # match the torch table construction.
    col = np.arange(d_pad)
    scale = np.float32(-math.log(10000.0) / d_model)
    base = np.exp((2 * (col // 2)).astype(np.float32) * scale).astype(np.float32)
    div_full_np = np.where(col < d_model, base, np.float32(0.0)).astype(np.float32)
    div_full = jnp.asarray(div_full_np).reshape(1, d_pad)

    # Token tile: multiple of 8; big default to amortize per-step overhead,
    # but keep >= 2 grid steps when there is enough work (megacore sharding).
    tn = _round_up(max(8, min(tn, N)), 8)
    if N > 8:
        tn = min(tn, _round_up((N + 1) // 2, 8))
    n_pad = _round_up(N, tn)
    num_tiles = n_pad // tn

    idx_col = jnp.pad(idx_f, (0, n_pad - N)).reshape(n_pad, 1)

    # VMEM budget from actual footprint (double-buffered tiles) with a
    # generation-aware ceiling (~75% of physical VMEM).
    needed = (2 * tn * d_pad + 2 * tn + 2 * d_pad) * 4 + (2 << 20)
    try:
        vmem_cap = int(getattr(pltpu.get_tpu_info(), "vmem_capacity_bytes",
                               64 << 20))
    except Exception:
        vmem_cap = 64 << 20
    vmem_limit = int(min(max(needed, 4 << 20), (vmem_cap * 3) // 4))

    out = pl.pallas_call(
        _pe_compute_kernel,
        out_shape=jax.ShapeDtypeStruct((n_pad, d_pad), jnp.float32),
        grid=(num_tiles,),
        in_specs=[
            pl.BlockSpec((tn, 1), lambda i: (i, 0)),       # per-tile indices
            pl.BlockSpec((1, d_pad), lambda i: (0, 0)),    # constant div row
        ],
        out_specs=pl.BlockSpec((tn, d_pad), lambda i: (i, 0)),
        compiler_params=pltpu.CompilerParams(
            dimension_semantics=("parallel",),             # megacore sharding
            vmem_limit_bytes=vmem_limit,
        ),
    )(idx_col, div_full)

    # Strip padding and restore the original leading shape (free metadata ops).
    return out[:N, :d_model].reshape(*orig_shape, d_model)


if __name__ == "__main__":
    d_model = 32
    max_len = 64
    B, T = 2, 8

    # pos in [0, ~0.9) so round(pos * max_len) stays strictly inside the table
    # (matches the valid-index precondition of the PyTorch module).
    key = jax.random.PRNGKey(0)
    pos = jax.random.uniform(key, (B, T), dtype=jnp.float32) * 0.9

    out = positional_encoding_trans(pos, d_model, max_len)
    out = jax.block_until_ready(out)

    # Pure-JAX reference of the original forward pass (table build + gather).
    pe = _build_pe_table(d_model, max_len)
    ref_idx = jnp.clip(jnp.round(pos * max_len).astype(jnp.int32), 0, max_len - 1)
    ref = jnp.take(pe, ref_idx.reshape(-1), axis=0).reshape(B, T, d_model)

    assert out.shape == (B, T, d_model)
    # In-kernel sin/cos vs the XLA-built table: allow tiny transcendental
    # implementation differences (values are in [-1, 1]).
    np.testing.assert_allclose(np.asarray(out), np.asarray(ref),
                               rtol=1e-4, atol=1e-4)
    print("KERNEL_OK")
</pallas_src>

<mosaic_0001>
module attributes {stable_mosaic.version = 11 : i64} {
  func.func @_pe_compute_kernel(%arg0: i32, %arg1: memref<8x1xf32, #tpu.memory_space<vmem>>, %arg2: memref<1x128xf32, #tpu.memory_space<vmem>>, %arg3: memref<8x128xf32, #tpu.memory_space<vmem>>) attributes {dimension_semantics = [#tpu.dimension_semantics<parallel>], iteration_bounds = array<i64: 2>, scalar_prefetch = 0 : i64, scratch_operands = 0 : i64, tpu.core_type = #tpu.core_type<tc>, window_params = [{transform_indices = @transform_0, window_bounds = array<i64: 8, 1>}, {pipeline_mode = #tpu.pipeline_mode<synchronous>, transform_indices = @transform_1, window_bounds = array<i64: 1, 128>}, {transform_indices = @transform_2, window_bounds = array<i64: 8, 128>}]} {
    %c0 = arith.constant 0 : index
    %c0_0 = arith.constant 0 : index
    %0 = vector.load %arg1[%c0, %c0_0] : memref<8x1xf32, #tpu.memory_space<vmem>>, vector<8x1xf32>
    %c0_1 = arith.constant 0 : index
    %c0_2 = arith.constant 0 : index
    %1 = vector.load %arg2[%c0_1, %c0_2] : memref<1x128xf32, #tpu.memory_space<vmem>>, vector<1x128xf32>
    %2 = vector.broadcast %0 : vector<8x1xf32> to vector<8x128xf32>
    %3 = vector.broadcast %1 : vector<1x128xf32> to vector<8x128xf32>
    %4 = arith.mulf %2, %3 : vector<8x128xf32>
    %5 = tpu.iota {dimensions = array<i32: 1>} : vector<8x128xi32>
    %c1_i32 = arith.constant 1 : i32
    %6 = vector.broadcast %c1_i32 : i32 to vector<8x128xi32>
    %7 = arith.andi %5, %6 : vector<8x128xi32>
    %c0_i32 = arith.constant 0 : i32
    %8 = vector.broadcast %c0_i32 : i32 to vector<8x128xi32>
    %9 = arith.cmpi eq, %7, %8 : vector<8x128xi32>
    %10 = math.sin %4 : vector<8x128xf32>
    %11 = math.cos %4 : vector<8x128xf32>
    %12 = arith.select %9, %10, %11 : vector<8x128xi1>, vector<8x128xf32>
    %c0_3 = arith.constant 0 : index
    %c0_4 = arith.constant 0 : index
    %13 = vector.load %arg3[%c0_3, %c0_4] : memref<8x128xf32, #tpu.memory_space<vmem>>, vector<8x128xf32>
    tpu.vector_store %arg3[%c0_3, %c0_4], %12 {strides = array<i32>} : memref<8x128xf32, #tpu.memory_space<vmem>>, vector<8x128xf32>,
    return
  }
  func.func @transform_0(%arg0: i32) -> (i32, i32) {
    %c0_i32 = arith.constant 0 : i32
    %c0_i32_0 = arith.constant 0 : i32
    return %arg0, %c0_i32 : i32, i32
  }
  func.func @transform_1(%arg0: i32) -> (i32, i32) {
    %c0_i32 = arith.constant 0 : i32
    %c0_i32_0 = arith.constant 0 : i32
    %c0_i32_1 = arith.constant 0 : i32
    return %c0_i32, %c0_i32_0 : i32, i32
  }
  func.func @transform_2(%arg0: i32) -> (i32, i32) {
    %c0_i32 = arith.constant 0 : i32
    %c0_i32_0 = arith.constant 0 : i32
    return %arg0, %c0_i32 : i32, i32
  }
}

</mosaic_0001>

<bundles_post_ra>
// kernel: tpu_custom_call.1
= control target key start
LH: loop header
LB: loop body
LE: loop exit
PB: predicated region body
PF: predicated region fallthrough
CT: control target
= control target key end

     0   :  { %7 = vsyncpa [#allocation3], 0  ;;  %s737_s0 = inlined_call_operand.vmem [shape: f32[16,1], index: 0, kind: input, shape index: {}]   ;;  %s738_s1 = inlined_call_operand.vmem [shape: f32[1,128], index: 1, kind: input, shape index: {}]   ;;  %s739_s2 = inlined_call_operand.hbm [shape: f32[16,128], index: 2, kind: output, shape index: {}]  }
   0x1   :  { %9 = vsyncpa [#allocation3 + $0x1], 0  ;;  %s600_s9 = smov 0   ;;  %s602_s10 = smov 0  }
   0x2   :  { %s604_s11 = smov 0   ;;  %s606_s12 = smov 0  }
   0x3 LB: > { %s621_s13 = sadd.s32 4294967295, %s575_s12   ;;  %s439_s14 = sadd.s32 4294967294, %s575_s12   ;;  %s575_s12 = sphi %s606_s12, %s747_s12   ;;  %s571_s11 = sphi %s604_s11, %s746_s11   ;;  %s567_s10 = sphi %s602_s10, %s745_s10   ;;  %s563_s9 = sphi %s600_s9, %s744_s9  }
   0x4   : > { %s625_s15 = sadd.s32 1, %s575_s12   ;;  %s69_s16 = sadd.s32 1, %s571_s11 }
   0x5   : > { %s66_s17 = ssub.s32 %s575_s12, %s625_s15  ;;  %p79_p0 = scmp.ne.s32.totalorder %s571_s11, %s567_s10 }
   0x6   : > { %p67_p1 = scmp.eq.s32.totalorder %s66_s17, 0  ;;  %p80_p2 = scmp.eq.s32.totalorder %s621_s13, 1 }
   0x7   : > { %p85_p3 = scmp.ne.s32.totalorder %s567_s10, %s563_s9  ;;  %p86_p4 = scmp.eq.s32.totalorder %s439_s14, 1 }
   0x8   : > { %s636_s18 = scalar_select %p67_p1, %s571_s11, %s69_s16  }
   0x9   : > { %p638_p5 = por %p80_p2, %p79_p0  ;;  %p642_p6 = por %p86_p4, %p85_p3 }
   0xa   : > { %p442_p7 = scmp.ge.s32.totalorder %s575_s12, 1  ;;  %p114_p8 = scmp.lt.s32.totalorder %s575_s12, 3 }
   0xc   : > { %p115_p9 = pnand %p442_p7, %p114_p8 }
   0xd   : > { %p135_p10 = scmp.lt.s32.totalorder (!%p115_p9), %s621_s13, 1  ;;  %v577_v0 = vmov (!%p115_p9), 0   ;;  %v445_v2 = vld [vmem:[%s738_s1] ss:$0 sm:$0xff] (!%p115_p9)  ;;  %v578_v15 = vmov (!%p115_p9), 683565275  }
   0xe   : > { %118 = sbr.rel (%p115_p9) target bundleno = 250 (0xfa), region = 28  ;;  %508 = vset.pattern.permute.xlu0 (!%p115_p9), %v577_v0  ;;  %v579_v17 = vmov (!%p115_p9), 2475754826   ;;  %v580_v20 = vmov (!%p115_p9), 2131351028   ;;  %s132_s28 = sand.u32 (!%p115_p9), 1, %s567_s10  }
   0xf   : > { %v581_v23 = vmov (!%p115_p9), 2102212464   ;;  %v582_v26 = vmov (!%p115_p9), 920167782   ;;  %v583_v29 = vmov (!%p115_p9), 1326507024  }
  0x10   : > { %s679_s29 = sshll.u32 (!%p115_p9), %s132_s28, 3  ;;  %s455_s30 = sshll.u32 (!%p115_p9), %s621_s13, 7 }
  0x11   : > { %s134_s3 = scalar_lea.vmem (!%p115_p9), [#allocation2], %s679_s29  ;;  %s691_s7 = scalar_lea.hbm (!%p115_p9), %s739_s2, %s455_s30 }
  0x12   : > { %s380_s4 = sshll.u32 (!%p115_p9), %s134_s3, 4  ;;  %s367_s8 = scalar_lea.sflag (!%p115_p9), [#allocation3], %s132_s28  ;;  %s693_s4 = int_to_ptr.vmem [resolvable:$true] %s380_s4 }
  0x13   : > { %s584_s14 = smov (!%p115_p9), [#allocation2]  }
  0x14   : > { %s517_s16 = sshll.u32 (!%p115_p9), %s584_s14, 4  ;;  %s518_s16 = int_to_ptr.vmem [resolvable:$false] %s517_s16 }
  0x15   : > { %s136_s21 = scalar_select %p135_p10, %s621_s13, 1 }
  0x16   : > { %s513_s13 = scalar_lea.vmem %s693_s4, 128  ;;  %s519_s17 = scalar_lea.vmem %s518_s16, 256 }
  0x17   : > { %s444_s22 = sshll.u32 %s136_s21, 3  ;;  %p514_p11 = scmp.ne.s32.totalorder %s693_s4, %s513_s13 }
  0x18   : > { %s138_s25 = scalar_lea.vmem %s737_s0, %s444_s22  ;;  %p520_p0 = scmp.lt.s32.totalorder %s693_s4, %s518_s16 }
  0x19   : > { %v139_v1 = vld [vmem:[%s138_s25] sm:$0xff]  ;;  %p515_p12 = pnand %p514_p11, %p638_p5  ;;  %p521_p1 = scmp.lt.s32.totalorder %s519_s17, %s513_s13 }
  0x1a   : > { %143 = vperm.xlu0 %508, %v139_v1  }
  0x1b   : > { %p516_p13 = pneg %p515_p12  ;;  %p522_p2 = por %p521_p1, %p520_p0 }
  0x1d   : > { %p523_p3 = pnand %p522_p2, %p516_p13 }
  0x99   : > { %v144_v3 = vpop.permute.xlu0 %143 }
  0x9a   : > { %v656_v4 = vmul.f32 %v445_v2, %v144_v3 }
  0x9c   : > { %v160_v5 = vand.u32 2139095040, %v656_v4  ;;  %v157_v9 = vand.u32 2147483647, %v656_v4  ;;  %vm159_vm7 = vcmp.lt.s32.totalorder %v656_v4, 0 }
  0x9e   : > { %v161_v6 = vshrl.u32 %v160_v5, 23  ;;  %v164_v12 = vand.u32 8388607, %v157_v9  ;;  %vm158_vm8 = vcmp.le.f32.partialorder %v157_v9, 0.7853982 }
  0xa0   : > { %v446_v7 = vadd.s32 4294967169, %v161_v6  ;;  %v165_v31 = vor.u32 8388608, %v164_v12 }
  0xa2   : > { %v167_v8 = vadd.s32 1, %v446_v7  ;;  %v205_v45 = vshll.u32 %v165_v31, 8 }
  0xa4   : > { %vm168_vm0 = vcmp.gt.s32.totalorder %v167_v8, 0 }
  0xa5   : > { %v169_v10 = vsel %vm168_vm0, %v167_v8, 0  ;;  %vm249_vm0 = vweird.f32 %v656_v4 }
  0xa6   : > { %v171_v11 = vand.u32 31, %v169_v10  ;;  %v170_v14 = vshrl.u32 %v169_v10, 5 }
  0xa8   : > { %v172_v13 = vsub.s32 32, %v171_v11  ;;  %v174_v16 = vshll.u32 %v578_v15, %v171_v11  ;;  %v177_v18 = vshll.u32 %v579_v17, %v171_v11  ;;  %v180_v22 = vshll.u32 %v580_v20, %v171_v11 }
  0xa9   : > { %v183_v25 = vshll.u32 %v581_v23, %v171_v11  ;;  %v186_v28 = vshll.u32 %v582_v26, %v171_v11  ;;  %vm189_vm1 = vcmp.lt.s32.totalorder %v170_v14, 1  ;;  %vm192_vm2 = vcmp.lt.s32.totalorder %v170_v14, 4 }
  0xaa   : > { %v175_v19 = vshrl.u32 %v579_v17, %v172_v13  ;;  %v178_v21 = vshrl.u32 %v580_v20, %v172_v13  ;;  %v181_v24 = vshrl.u32 %v581_v23, %v172_v13  ;;  %v184_v27 = vshrl.u32 %v582_v26, %v172_v13 }
  0xab   : > { %v187_v30 = vshrl.u32 %v583_v29, %v172_v13  ;;  %v173_v40 = vshrl.u32 %v578_v15, %v172_v13  ;;  %vm191_vm3 = vcmp.lt.s32.totalorder %v170_v14, 3  ;;  %vm190_vm4 = vcmp.lt.s32.totalorder %v170_v14, 2 }
  0xac   : > { %v176_v32 = vor.u32 %v175_v19, %v174_v16  ;;  %v179_v33 = vor.u32 %v178_v21, %v177_v18  ;;  %v182_v34 = vor.u32 %v181_v24, %v180_v22  ;;  %v185_v35 = vor.u32 %v184_v27, %v183_v25 }
  0xad   : > { %v188_v36 = vor.u32 %v187_v30, %v186_v28  ;;  %v153_v23 = vlaneseq }
  0xae   : > { %v194_v37 = vsel %vm192_vm2, %v182_v34, 2102212464  ;;  %v197_v38 = vsel %vm189_vm1, %v176_v32, %v179_v33  ;;  %v201_v39 = vsel %vm189_vm1, %v179_v33, %v182_v34  ;;  %v198_v41 = vsel %vm192_vm2, %v185_v35, 920167782 }
  0xaf   : > { %v202_v42 = vsel %vm192_vm2, %v188_v36, 1326507024  ;;  %v199_v43 = vsel %vm191_vm3, %v182_v34, %v198_v41  ;;  %v193_v46 = vsel %vm189_vm1, %v173_v40, %v176_v32  ;;  %v195_v47 = vsel %vm191_vm3, %v179_v33, %v194_v37 }
  0xb0   : > { %v203_v44 = vsel %vm191_vm3, %v185_v35, %v202_v42  ;;  %v200_v48 = vsel %vm190_vm4, %v197_v38, %v199_v43  ;;  %v196_v54 = vsel %vm190_vm4, %v193_v46, %v195_v47  ;;  %v154_v25 = vand.u32 127, %v153_v23 }
  0xb1   : > { %v204_v49 = vsel %vm190_vm4, %v201_v39, %v203_v44  ;;  %v665_v52 = vmul.u32.u64.low %v205_v45, %v200_v48  ;;  %v666_v53 = vmul.u32.u64.high %v205_v45, %v200_v48, %v665_v52  ;;  %v212_v56 = vmul.u32 %v205_v45, %v196_v54 }
  0xb2   : > { %v662_v50 = vmul.u32.u64.low %v205_v45, %v204_v49  ;;  %v663_v51 = vmul.u32.u64.high %v205_v45, %v204_v49, %v662_v50  ;;  %v155_v27 = vand.u32 1, %v154_v25 }
  0xb3   : > { %v215_v55 = vadd.s32 1, %v666_v53 }
  0xb4   : > { %vm214_vm5 = vc.u32 %v663_v51, %v665_v52  ;;  %v213_v5 = vadd.s32 %v665_v52, %v663_v51  ;;  %vm681_vm9 = vcmp.eq.s32.totalorder %v155_v27, 0 }
  0xb5   : > { %v216_v57 = vsel %vm214_vm5, %v215_v55, %v666_v53 }
  0xb6   : > { %v217_v58 = vadd.s32 %v216_v57, %v212_v56 }
  0xb8   : > { %v218_v59 = vadd.s32 536870912, %v217_v58 }
  0xba   : > { %v219_v60 = vshrl.u32 %v218_v59, 30 }
  0xbc   : > { %v220_v61 = vshll.u32 %v219_v60, 30  ;;  %v243_v18 = vsub.s32 4, %v219_v60 }
  0xbe   : > { %v221_v62 = vsub.s32 %v217_v58, %v220_v61  ;;  %v244_v21 = vsel %vm159_vm7, %v243_v18, %v219_v60 }
  0xbf   : > { %v246_v24 = vsel %vm158_vm8, 0, %v244_v21 }
  0xc0   : > { %v223_v63 = vsub.s32 0, %v221_v62  ;;  %v250_v26 = vadd.s32 3, %v246_v24  ;;  %v354_v29 = vand.u32 3, %v246_v24 }
  0xc2   : > { %v447_v0 = vmin.u32 %v223_v63, %v221_v62  ;;  %v251_v28 = vand.u32 3, %v250_v26  ;;  %vm359_vm11 = vcmp.eq.s32.totalorder %v354_v29, 2  ;;  %vm356_vm13 = vcmp.eq.s32.totalorder %v354_v29, 0 }
  0xc3   : > { %vm355_vm15 = vcmp.lt.s32.totalorder %v354_v29, 2 }
  0xc4   : > { %v225_v1 = vclz %v447_v0  ;;  %vm256_vm10 = vcmp.eq.s32.totalorder %v251_v28, 2  ;;  %vm253_vm12 = vcmp.eq.s32.totalorder %v251_v28, 0  ;;  %vm252_vm14 = vcmp.lt.s32.totalorder %v251_v28, 2 }
  0xc6   : > { %v448_v2 = vadd.s32 4294967294, %v225_v1 }
  0xc8   : > { %vm449_vm6 = vcmp.lt.s32.totalorder %v448_v2, 0 }
  0xc9   : > { %v228_v3 = vsel %vm449_vm6, 0, %v448_v2 }
  0xca   : > { %v229_v6 = vsub.s32 32, %v228_v3  ;;  %v233_v7 = vsub.s32 4294967266, %v228_v3  ;;  %v230_v8 = vshll.u32 %v221_v62, %v228_v3 }
  0xcc   : > { %v231_v10 = vshrl.u32 %v213_v5, %v229_v6  ;;  %v234_v11 = vadd.s32 127, %v233_v7 }
  0xce   : > { %v232_v12 = vor.u32 %v231_v10, %v230_v8  ;;  %v235_v13 = vshll.u32 %v234_v11, 23 }
  0xd0   : > { %v236_v14 = vor.u32 4788187, %v235_v13  ;;  %v239_v16 = vcvt.s32.f32 %v232_v12 }
  0xd2   : > { %v237_v15 = vand.u32 2147483647, %v236_v14 }
  0xd4   : > { %v240_v17 = vmul.f32 %v239_v16, %v237_v15 }
  0xd6   : > { %v241_v19 = vxor.u32 2147483648, %v240_v17 }
  0xd8   : > { %v242_v20 = vsel %vm159_vm7, %v241_v19, %v240_v17 }
  0xd9   : > { %v245_v22 = vsel %vm158_vm8, %v656_v4, %v242_v20 }
  0xda   : > { %509 = vcosq.f32 %v245_v22 }
  0xdb   : > { %511 = vsinq.f32 %v245_v22 }
  0xe4   : > { %v510_v9 = vpop.eup %509 }
  0xe5   : > { %v512_v30 = vpop.eup %511  ;;  %v257_v31 = vxor.u32 2147483648, %v510_v9 }
  0xe6   : > { %v254_v33 = vxor.u32 2147483648, %v512_v30 }
  0xe7   : > { %v258_v34 = vsel %vm256_vm10, %v257_v31, %v512_v30  ;;  %v361_v35 = vsel %vm359_vm11, %v257_v31, %v512_v30 }
  0xe8   : > { %v255_v36 = vsel %vm253_vm12, %v510_v9, %v254_v33  ;;  %v358_v37 = vsel %vm356_vm13, %v510_v9, %v254_v33 }
  0xe9   : > { %v259_v38 = vsel %vm252_vm14, %v255_v36, %v258_v34  ;;  %v362_v39 = vsel %vm355_vm15, %v358_v37, %v361_v35 }
  0xea   : > { %v260_v40 = vsel %vm249_vm0, nan, %v259_v38  ;;  %v363_v41 = vsel %vm249_vm0, nan, %v362_v39 }
  0xeb   : > { %v364_v42 = vsel %vm681_vm9, %v260_v40, %v363_v41 }
  0xec   : > { %365 = vst [vmem:[%s134_s3] sm:$0xff] %v364_v42 }
  0xed   : > { %526 = shalt.err (!%p523_p3)
}
  0xee   : > { %s527_s21 = scalar_lea.hbm %s691_s7, 128  ;;  %s531_s24 = scalar_lea.hbm %s739_s2, 256 }
  0xef   : > { %p528_p4 = scmp.ne.s32.totalorder %s691_s7, %s527_s21  ;;  %p532_p9 = scmp.lt.u32.totalorder %s691_s7, %s739_s2 }
  0xf0   : > { %p533_p10 = scmp.lt.u32.totalorder %s531_s24, %s527_s21  ;;  %p535_p12 = scmp.lt.u32.totalorder %s527_s21, %s691_s7 }
  0xf1   : > { %p529_p7 = pnand %p528_p4, %p638_p5 }
  0xf2   : > { %p534_p11 = por %p533_p10, %p532_p9 }
  0xf3   : > { %p530_p8 = pneg %p529_p7 }
  0xf4   : > { %p536_p13 = por %p535_p12, %p534_p11 }
  0xf6   : > { %p537_p0 = pnand %p536_p13, %p530_p8 }
  0xf8   : > { %540 = shalt.err (!%p537_p0)
}
  0xf9   : > { %462 = dma.vmem_to_hbm [thread:$0]  (%p638_p5), %s693_s4, 128, %s691_s7, %s367_s8  }
  0xfa PF: > { %p468_p1 = scmp.ge.s32.totalorder %s575_s12, 2  ;;  %s392_s27 = sand.u32 1, %s563_s9  }
  0xfb   : > { %s393_s28 = scalar_lea.sflag [#allocation3], %s392_s27 }
  0xfc   : > { %p465_p2 = pnand %p468_p1, %p642_p6 }
  0xfe   : > { %558 = dma.done.wait (!%p465_p2), %s393_s28, 128  }
  0xff   : > { %560 = vsyncadd (!%p465_p2), %s393_s28, 4294967168  ;;  %p12_p3 = scmp.ge.s32.totalorder %s625_s15, 4   ;;  %s744_s9 = smov %s567_s10 }
 0x100   : > { %s745_s10 = smov %s571_s11  ;;  %s746_s11 = smov %s636_s18 }
 0x101   : > { %s747_s12 = smov %s625_s15  ;;  %14 = sbr.rel (!%p12_p3) target bundleno = 3 (0x3), region = 63 }
 0x108   :  { %398 = vsyncpa [#allocation3], 1 }
 0x109   :  { %400 = vsyncpa [#allocation3 + $0x1], 1 }

</bundles_post_ra>
